<compile_context>
chip_gen: v7x
topology: tpu7x:2x2x1
jax: 0.10.0
libtpu: 0.0.40
codegen_flags: <defaults>
</compile_context>

<pallas_src>
import jax
import jax.numpy as jnp
from jax.experimental import pallas as pl
from jax.experimental.pallas import tpu as pltpu


def relu_conv1x1_kernel(w_ref, x_ref, o_ref):
    # Hot path: ReLU on the VPU, 1x1 conv as a matmul on the MXU.
    x = jnp.maximum(x_ref[...], 0.0)
    o_ref[...] = jnp.dot(
        w_ref[...], x, preferred_element_type=jnp.float32
    ).astype(o_ref.dtype)


def _spatial_tile(hw, cap=4096):
    """Lane tile over the flattened spatial axis.

    Full extent if it fits the cap (always a legal block dim); otherwise a
    large multiple of 128 so stores stay unmasked and lane-dense.
    """
    if hw <= cap:
        return hw
    return max(128, (cap // 128) * 128)


def relu_conv1x1(x_nchw, weight, *, tn_cap=4096):
    """y = Conv2d(1x1, stride 1, no bias)(ReLU(x)).

    x_nchw: (N, C_in, H, W) float32; weight: (C_out, C_in, 1, 1) float32.
    Returns (N, C_out, H, W) float32.
    """
    N, C_in, H, W = x_nchw.shape
    C_out = weight.shape[0]
    HW = H * W

    w2d = weight.reshape(C_out, C_in)
    x3 = x_nchw.reshape(N, C_in, HW)            # free reshape, no HBM copy

    tn = _spatial_tile(HW, tn_cap)
    grid = (N, pl.cdiv(HW, tn))

    cost = pl.CostEstimate(
        flops=2 * C_in * C_out * N * HW,
        transcendentals=0,
        bytes_accessed=(C_in + C_out) * N * HW * 4 + C_out * C_in * 4,
    )

    out = pl.pallas_call(
        relu_conv1x1_kernel,
        out_shape=jax.ShapeDtypeStruct((N, C_out, HW), x_nchw.dtype),
        grid_spec=pltpu.PrefetchScalarGridSpec(
            num_scalar_prefetch=0,
            grid=grid,
            in_specs=[
                # Tiny weight: constant index_map -> resident in VMEM.
                pl.BlockSpec((C_out, C_in), lambda n, j: (0, 0)),
                # Activations: one batch element (squeezed), all channels,
                # one lane-dense spatial tile.
                pl.BlockSpec((pl.Squeezed(), C_in, tn), lambda n, j: (n, 0, j)),
            ],
            out_specs=pl.BlockSpec(
                (pl.Squeezed(), C_out, tn), lambda n, j: (n, 0, j)
            ),
        ),
        compiler_params=pltpu.CompilerParams(
            # No accumulation across the grid -> both axes independent;
            # enables megacore sharding on v7x, no-op elsewhere.
            dimension_semantics=("parallel", "parallel"),
        ),
        cost_estimate=cost,
    )(w2d, x3)

    return out.reshape(N, C_out, H, W)          # free reshape back to NCHW


if __name__ == "__main__":
    key = jax.random.PRNGKey(0)
    k_x, k_w = jax.random.split(key)

    # Small shapes consistent with the module: channels must be 16 for the
    # 16->16 1x1 conv; shrink batch/spatial for a quick test.
    N, C, H, W = 2, 16, 16, 16
    x = jax.random.normal(k_x, (N, C, H, W), dtype=jnp.float32)
    # Deterministic weight init (kaiming-uniform-ish bound, fixed seed).
    bound = 1.0 / jnp.sqrt(jnp.float32(C))
    weight = jax.random.uniform(
        k_w, (16, 16, 1, 1), dtype=jnp.float32, minval=-bound, maxval=bound
    )

    y = relu_conv1x1(x, weight)
    y = jax.block_until_ready(y)

    # Reference check in plain JAX.
    x_relu = jnp.maximum(x, 0.0)
    ref = jnp.einsum("oc,nchw->nohw", weight.reshape(16, 16), x_relu)
    assert y.shape == (N, 16, H, W)
    assert jnp.allclose(y, ref, atol=1e-5, rtol=1e-5)

    print("KERNEL_OK")
</pallas_src>

<mosaic_0001>
module attributes {stable_mosaic.version = 11 : i64} {
  func.func @relu_conv1x1_kernel(%arg0: i32, %arg1: i32, %arg2: memref<16x16xf32, #tpu.memory_space<vmem>>, %arg3: memref<1x16x256xf32, #tpu.memory_space<vmem>>, %arg4: memref<1x16x256xf32, #tpu.memory_space<vmem>>) attributes {dimension_semantics = [#tpu.dimension_semantics<parallel>, #tpu.dimension_semantics<parallel>], iteration_bounds = array<i64: 2, 1>, scalar_prefetch = 0 : i64, scratch_operands = 0 : i64, tpu.core_type = #tpu.core_type<tc>, window_params = [{pipeline_mode = #tpu.pipeline_mode<synchronous>, transform_indices = @transform_0, window_bounds = array<i64: 16, 16>}, {transform_indices = @transform_1, window_bounds = array<i64: 1, 16, 256>}, {transform_indices = @transform_2, window_bounds = array<i64: 1, 16, 256>}]} {
    %c0 = arith.constant 0 : index
    %c0_0 = arith.constant 0 : index
    %c0_1 = arith.constant 0 : index
    %0 = vector.load %arg3[%c0, %c0_0, %c0_1] : memref<1x16x256xf32, #tpu.memory_space<vmem>>, vector<1x16x256xf32>
    %1 = vector.shape_cast %0 : vector<1x16x256xf32> to vector<16x256xf32>
    %cst = arith.constant 0.000000e+00 : f32
    %2 = vector.broadcast %cst : f32 to vector<16x256xf32>
    %3 = arith.maximumf %1, %2 : vector<16x256xf32>
    %c0_2 = arith.constant 0 : index
    %c0_3 = arith.constant 0 : index
    %4 = vector.load %arg2[%c0_2, %c0_3] : memref<16x16xf32, #tpu.memory_space<vmem>>, vector<16x16xf32>
    %cst_4 = arith.constant dense<0.000000e+00> : vector<16x256xf32>
    %5 = tpu.matmul %4, %3, %cst_4 {dimension_numbers = #tpu.dot_dimension_numbers<[1], [0], [0], [1], [0, 0, 1, 1], [], []>} : vector<16x16xf32>, vector<16x256xf32>, vector<16x256xf32> -> vector<16x256xf32>
    %c0_5 = arith.constant 0 : index
    %c0_6 = arith.constant 0 : index
    %c0_7 = arith.constant 0 : index
    %6 = vector.load %arg4[%c0_5, %c0_6, %c0_7] : memref<1x16x256xf32, #tpu.memory_space<vmem>>, vector<1x16x256xf32>
    %7 = vector.shape_cast %6 : vector<1x16x256xf32> to vector<16x256xf32>
    %8 = vector.shape_cast %5 : vector<16x256xf32> to vector<1x16x256xf32>
    tpu.vector_store %arg4[%c0_5, %c0_6, %c0_7], %8 {strides = array<i32>} : memref<1x16x256xf32, #tpu.memory_space<vmem>>, vector<1x16x256xf32>,
    return
  }
  func.func @transform_0(%arg0: i32, %arg1: i32) -> (i32, i32) {
    %c0_i32 = arith.constant 0 : i32
    %c0_i32_0 = arith.constant 0 : i32
    %c0_i32_1 = arith.constant 0 : i32
    return %c0_i32, %c0_i32_0 : i32, i32
  }
  func.func @transform_1(%arg0: i32, %arg1: i32) -> (i32, i32, i32) {
    %c0_i32 = arith.constant 0 : i32
    %c0_i32_0 = arith.constant 0 : i32
    return %arg0, %c0_i32, %arg1 : i32, i32, i32
  }
  func.func @transform_2(%arg0: i32, %arg1: i32) -> (i32, i32, i32) {
    %c0_i32 = arith.constant 0 : i32
    %c0_i32_0 = arith.constant 0 : i32
    return %arg0, %c0_i32, %arg1 : i32, i32, i32
  }
}

</mosaic_0001>

<bundles_post_ra>
// kernel: tpu_custom_call.1
= control target key start
LH: loop header
LB: loop body
LE: loop exit
PB: predicated region body
PF: predicated region fallthrough
CT: control target
= control target key end

     0   :  { %7 = vsyncpa [#allocation3], 0  ;;  %s907_s0 = inlined_call_operand.hbm [shape: f32[16,16], index: 0, kind: input, shape index: {}]   ;;  %s908_s1 = inlined_call_operand.hbm [shape: f32[2,16,256], index: 1, kind: input, shape index: {}]   ;;  %s909_s2 = inlined_call_operand.hbm [shape: f32[2,16,256], index: 2, kind: output, shape index: {}]  }
   0x1   :  { %8 = vsyncpa [#allocation6], 0 }
   0x2   :  { %10 = vsyncpa [#allocation6 + $0x1], 0 }
   0x3   :  { %11 = vsyncpa [#allocation4], 0 }
   0x4   :  { %13 = vsyncpa [#allocation4 + $0x1], 0  ;;  %s688_s9 = smov 0   ;;  %s690_s10 = smov 0  }
   0x5   :  { %s692_s11 = smov 0   ;;  %s694_s12 = smov 0  }
   0x6   :  { %s696_s13 = smov 0   ;;  %s698_s14 = smov 0  }
   0x7 LB: > { %s410_s15 = sadd.s32 4294967295, %s661_s14   ;;  %s411_s16 = sadd.s32 4294967294, %s661_s14   ;;  %s661_s14 = sphi %s698_s14, %s19_s14   ;;  %s657_s13 = sphi %s696_s13, %s933_s13   ;;  %s653_s12 = sphi %s694_s12, %s932_s12   ;;  %s649_s11 = sphi %s692_s11, %s931_s11   ;;  %s645_s10 = sphi %s690_s10, %s930_s10   ;;  %s641_s9 = sphi %s688_s9, %s929_s9  }
   0x8   : > { %p74_p0 = scmp.ne.s32.totalorder %s645_s10, %s641_s9  ;;  %p722_p1 = scmp.eq.s32.totalorder %s410_s15, 0 }
   0x9   : > { %p726_p2 = scmp.eq.s32.totalorder %s410_s15, 1  ;;  %p106_p3 = scmp.eq.s32.totalorder %s411_s16, 1 }
   0xa   : > { %s914_s17 = scalar_select %p722_p1, 1, 0 }
   0xb   : > { %s915_s18 = scalar_select %p726_p2, 1, 0 }
   0xc   : > { %p732_p4 = por %p722_p1, %p74_p0  ;;  %p412_p5 = scmp.ge.s32.totalorder %s661_s14, 1 }
   0xd   : > { %p737_p6 = por %p106_p3, %p74_p0  ;;  %p113_p7 = scmp.lt.s32.totalorder %s661_s14, 3 }
   0xe   : > { %s916_s19 = scalar_select %p732_p4, 1, 0 }
   0xf   : > { %s917_s20 = scalar_select %p737_p6, 1, 0 }
  0x10   : > { %p742_p8 = pnand %p412_p5, %p113_p7  ;;  %s663_s22 = smov [#allocation2]  }
  0x11   : > { %s125_s23 = sshll.u32 %s663_s22, 4  ;;  %s31_s25 = sadd.s32 1, %s657_s13  ;;  %s126_s23 = int_to_ptr.vmem [resolvable:$true] %s125_s23 }
  0x12   : > { %s918_s21 = scalar_select %p742_p8, 1, 0 }
  0x13   : > { %p445_p9 = pneg %p742_p8  ;;  %s517_s28 = scalar_lea.hbm %s907_s0, 256 }
  0x14   : > { %p518_p12 = scmp.ne.s32.totalorder %s907_s0, %s517_s28  ;;  %p524_p5 = scmp.lt.u32.totalorder %s517_s28, %s907_s0 }
  0x15   : > { %p751_p11 = pnand %p445_p9, %p722_p1 }
  0x17   : > { %p519_p13 = pneg %p751_p11 }
  0x19   : > { %p520_p0 = pnand %p519_p13, %p518_p12 }
  0x1b   : > { %p521_p3 = pneg %p520_p0 }
  0x1d   : > { %p526_p7 = pnand %p524_p5, %p521_p3 }
  0x1f   : > { %529 = shalt.err (!%p526_p7)
}
  0x20   : > { %s530_s5 = scalar_lea.vmem %s126_s23, 256  ;;  %p538_p4 = scmp.lt.s32.totalorder %s126_s23, %s126_s23 }
  0x21   : > { %p531_p9 = scmp.ne.s32.totalorder %s126_s23, %s530_s5  ;;  %p539_p1 = scmp.lt.s32.totalorder %s530_s5, %s530_s5 }
  0x23   : > { %p533_p10 = pnand %p531_p9, %p519_p13  ;;  %p540_p8 = por %p539_p1, %p538_p4 }
  0x25   : > { %p534_p6 = pneg %p533_p10 }
  0x27   : > { %p541_p2 = pnand %p540_p8, %p534_p6 }
  0x29   : > { %544 = shalt.err (!%p541_p2)
}
  0x2a   : > { %s664_s6 = smov 128   ;;  %s665_s7 = smov 8  }
  0x2b   : > { %448 = dma.hbm_to_vmem [thread:$0]  (!%p751_p11), %s907_s0, 256, %s126_s23, [#allocation3], %s664_s6, %s664_s6, %s665_s7  }
  0x2c   : > { %p33_p1 = scmp.ge.s32.totalorder %s31_s25, 2  ;;  %s61_s16 = sadd.s32 1, %s649_s11 }
  0x2d   : > { %p68_p2 = scmp.ne.s32.totalorder %s649_s11, %s645_s10  ;;  %p69_p4 = scmp.eq.s32.totalorder %s661_s14, 0 }
  0x2e   : > { %s935_s25 = smov (%p33_p1, %s31_s25), 0  ;;  %p921_p8 = scmp.ne.s32.totalorder %s915_s18, 0 }
  0x2f   : > { %p778_p6 = por %p69_p4, %p68_p2  ;;  %s56_s24 = ssub.s32 %s657_s13, %s935_s25 }
  0x30   : > { %p784_p10 = por %p921_p8, %p68_p2  ;;  %p458_p12 = scmp.lt.s32.totalorder %s661_s14, 2 }
  0x31   : > { %p59_p11 = scmp.eq.s32.totalorder %s56_s24, 0  ;;  %s139_s23 = sand.u32 1, %s649_s11  }
  0x32   : > { %s415_s27 = sshll.u32 %s139_s23, 5  ;;  %s429_s29 = sshll.u32 %s657_s13, 9 }
  0x33   : > { %s793_s28 = scalar_select %p59_p11, %s649_s11, %s61_s16  }
  0x34   : > { %s799_s4 = scalar_lea.hbm %s908_s1, %s429_s29  ;;  %s143_s18 = scalar_lea.vmem [#allocation5], %s415_s27 }
  0x35   : > { %s152_s5 = sshll.u32 %s143_s18, 4  ;;  %p805_p13 = pnand %p458_p12, %p778_p6  ;;  %s801_s5 = int_to_ptr.vmem [resolvable:$true] %s152_s5 }
  0x36   : > { %s809_s7 = scalar_lea.sflag [#allocation6], %s139_s23  ;;  %s545_s8 = scalar_lea.hbm %s799_s4, 512 }
  0x37   : > { %p546_p0 = scmp.ne.s32.totalorder %s799_s4, %s545_s8  ;;  %p547_p3 = pneg %p805_p13 }
  0x38   : > { %s550_s22 = scalar_lea.hbm %s908_s1, 1024  ;;  %p551_p9 = scmp.lt.u32.totalorder %s799_s4, %s908_s1 }
  0x39   : > { %p548_p5 = pnand %p547_p3, %p546_p0  ;;  %p552_p1 = scmp.lt.u32.totalorder %s550_s22, %s545_s8 }
  0x3a   : > { %p554_p4 = scmp.lt.u32.totalorder %s545_s8, %s799_s4 }
  0x3b   : > { %p549_p7 = pneg %p548_p5  ;;  %p553_p2 = por %p552_p1, %p551_p9 }
  0x3d   : > { %p555_p6 = por %p554_p4, %p553_p2 }
  0x3f   : > { %p556_p8 = pnand %p555_p6, %p549_p7 }
  0x41   : > { %559 = shalt.err (!%p556_p8)
}
  0x42   : > { %s560_s23 = scalar_lea.vmem %s801_s5, 512  ;;  %s666_s29 = smov [#allocation5]  }
  0x43   : > { %p561_p12 = scmp.ne.s32.totalorder %s801_s5, %s560_s23  ;;  %s565_s30 = sshll.u32 %s666_s29, 4  ;;  %s566_s30 = int_to_ptr.vmem [resolvable:$false] %s565_s30 }
  0x44   : > { %s567_s3 = scalar_lea.vmem %s566_s30, 1024  ;;  %p568_p5 = scmp.lt.s32.totalorder %s801_s5, %s566_s30 }
  0x45   : > { %p563_p11 = pnand %p561_p12, %p547_p3  ;;  %p569_p9 = scmp.lt.s32.totalorder %s567_s3, %s560_s23 }
  0x47   : > { %p564_p0 = pneg %p563_p11  ;;  %p570_p1 = por %p569_p9, %p568_p5 }
  0x49   : > { %p571_p2 = pnand %p570_p1, %p564_p0 }
  0x4b   : > { %574 = shalt.err (!%p571_p2)
}
  0x4c   : > { %s667_s18 = smov 256   ;;  %s668_s8 = smov 16  }
  0x4d   : > { %452 = dma.hbm_to_vmem [thread:$0]  (!%p805_p13), %s799_s4, 512, %s801_s5, %s809_s7, %s667_s18, %s667_s18, %s668_s8  }
  0x4e   : > { %p924_p3 = scmp.ne.s32.totalorder %s918_s21, 0 }
  0x4f   : > { %p925_p7 = scmp.ne.s32.totalorder (!%p924_p3), %s914_s17, 0 }
  0x50   : > { %164 = sbr.rel (%p924_p3) target bundleno = 329 (0x149), region = 28 }
  0x57   : > { %628 = dma.done.wait (%p925_p7), [#allocation3], 256  }
  0x58   : > { %630 = vsyncadd (%p925_p7), [#allocation3], 4294967040  ;;  %s844_s15 = sand.u32 1, %s645_s10   ;;  %p926_p4 = scmp.ne.s32.totalorder %s916_s19, 0 }
  0x59   : > { %s420_s16 = sshll.u32 %s844_s15, 5  ;;  %s171_s22 = scalar_lea.sflag [#allocation6], %s844_s15 }
  0x5a   : > { %s174_s24 = scalar_lea.vmem [#allocation5], %s420_s16 }
  0x5b   : > { %632 = dma.done.wait (%p926_p4), %s171_s22, 512  }
  0x5c   : > { %634 = vsyncadd (%p926_p4), %s171_s22, 4294966784  ;;  %v669_v0 = vmov 0.0   ;;  %v198_v1 = vld [vmem:[%s174_s24 + $0x8] sm:$0xff]  ;;  %v200_v2 = vld [vmem:[%s174_s24 + $0x18] sm:$0xff]  ;;  %vm207_vm0 = vcmask 130048   ;;  %s194_s17 = scalar_lea.vmem [#allocation7], %s420_s16 }
  0x5d   : > { %278 = vmatprep.mubr.f32.mxu0 %v669_v0  ;;  %284 = vmatprep.mubr.f32.mxu1 %v669_v0  ;;  %v197_v3 = vld [vmem:[%s174_s24] sm:$0xff]  ;;  %v202_v4 = vmax.f32 %v198_v1, 0.0  ;;  %v204_v5 = vmax.f32 %v200_v2, 0.0  ;;  %v199_v6 = vld [vmem:[%s174_s24 + $0x10] sm:$0xff]  ;;  %v206_v12 = vld [vmem:[#allocation2 + $0x8] sm:$0xff]  ;;  %s311_s19 = sshll.u32 %s194_s17, 4  ;;  %s853_s19 = int_to_ptr.vmem [resolvable:$true] %s311_s19 }
  0x5e   : > { %v201_v7 = vmax.f32 %v197_v3, 0.0  ;;  %v203_v8 = vmax.f32 %v199_v6, 0.0  ;;  %v205_v11 = vld [vmem:[#allocation2] sm:$0xff]  ;;  %s430_s21 = sshll.u32 %s653_s12, 9  ;;  %s296_s7 = scalar_lea.sflag [#allocation4], %s844_s15 }
  0x5f   : > { %v431_v9 = vpack.c.bf16 %v204_v5, %v202_v4  ;;  %s858_s6 = scalar_lea.hbm %s909_s2, %s430_s21  ;;  %s575_s12 = scalar_lea.vmem %s853_s19, 512 }
  0x60   : > { %v433_v10 = vpack.c.bf16 %v203_v8, %v201_v7  ;;  %p576_p13 = scmp.ne.s32.totalorder %s853_s19, %s575_s12  ;;  %s670_s27 = smov [#allocation7]  }
  0x61   : > { %432 = vmatprep.subr.bf16.mxu0 %v431_v9  ;;  %435 = vmatprep.subr.bf16.mxu1 %v431_v9  ;;  %s579_s23 = sshll.u32 %s670_s27, 4  ;;  %s580_s23 = int_to_ptr.vmem [resolvable:$false] %s579_s23 }
  0x62   : > { %434 = vmatpush1.bf16.msra.mxu0 %v433_v10  ;;  %436 = vmatpush1.bf16.msra.mxu1 %v433_v10  ;;  %p577_p6 = pnand %p576_p13, %p784_p10  ;;  %s581_s29 = scalar_lea.vmem %s580_s23, 1024 }
  0x63   : > { %p582_p12 = scmp.lt.s32.totalorder %s853_s19, %s580_s23  ;;  %p583_p11 = scmp.lt.s32.totalorder %s581_s29, %s575_s12 }
  0x64   : > { %p578_p8 = pneg %p577_p6 }
  0x65   : > { %422 = vmatmul.mubr.msk.f32.vlgmr.msra.gmra.mrb[0].mxu0 %vm207_vm0, %v205_v11  ;;  %423 = vmatmul.mubr.msk.f32.vlgmr.msra.gmra.mrb[0].mxu1 %vm207_vm0, %v206_v12  ;;  %p584_p0 = por %p583_p11, %p582_p12 }
  0x67   : > { %p585_p5 = pnand %p584_p0, %p578_p8 }
 0x138   : > { %v280_v13 = vpop.f32.mrb[0].mxu0  ;;  %v286_v14 = vpop.f32.mrb[0].mxu1 }
 0x139   : > { %291 = vst [vmem:[%s194_s17] sm:$0xff] %v280_v13  ;;  %293 = vst [vmem:[%s194_s17 + $0x10] sm:$0xff] %v286_v14  ;;  %v282_v15 = vpop.f32.mrb[1].mxu0  ;;  %v288_v16 = vpop.f32.mrb[1].mxu1 }
 0x13a   : > { %292 = vst [vmem:[%s194_s17 + $0x8] sm:$0xff] %v282_v15  ;;  %294 = vst [vmem:[%s194_s17 + $0x18] sm:$0xff] %v288_v16 }
 0x13b   : > { %588 = shalt.err (!%p585_p5)
}
 0x13c   : > { %s589_s30 = scalar_lea.hbm %s858_s6, 512  ;;  %s593_s8 = scalar_lea.hbm %s909_s2, 1024 }
 0x13d   : > { %p590_p9 = scmp.ne.s32.totalorder %s858_s6, %s589_s30  ;;  %p594_p3 = scmp.lt.u32.totalorder %s858_s6, %s909_s2 }
 0x13e   : > { %p595_p7 = scmp.lt.u32.totalorder %s593_s8, %s589_s30  ;;  %p597_p13 = scmp.lt.u32.totalorder %s589_s30, %s858_s6 }
 0x13f   : > { %p591_p1 = pnand %p590_p9, %p784_p10 }
 0x140   : > { %p596_p4 = por %p595_p7, %p594_p3 }
 0x141   : > { %p592_p2 = pneg %p591_p1 }
 0x142   : > { %p598_p6 = por %p597_p13, %p596_p4 }
 0x144   : > { %p599_p8 = pnand %p598_p6, %p592_p2 }
 0x146   : > { %602 = shalt.err (!%p599_p8)
}
 0x147   : > { %s671_s24 = smov 256   ;;  %s672_s17 = smov 16  }
 0x148   : > { %443 = dma.vmem_to_hbm [thread:$0]  (%p784_p10), %s853_s19, 512, %s858_s6, %s296_s7, %s671_s24, %s671_s24, %s672_s17  }
 0x149 PF: > { %s326_s21 = sand.u32 1, %s641_s9   ;;  %p927_p12 = scmp.ne.s32.totalorder %s917_s20, 0 }
 0x14a   : > { %p928_p11 = scmp.ge.s32.totalorder %s661_s14, 2  ;;  %s327_s4 = scalar_lea.sflag [#allocation4], %s326_s21 }
 0x14c   : > { %p454_p0 = pnand %p928_p11, %p927_p12 }
 0x14e   : > { %636 = dma.done.wait (!%p454_p0), %s327_s4, 512  }
 0x14f   : > { %638 = vsyncadd (!%p454_p0), %s327_s4, 4294966784  ;;  %s19_s14 = sadd.s32 1, %s661_s14   ;;  %s929_s9 = smov %s645_s10 }
 0x150   : > { %p16_p5 = scmp.ge.s32.totalorder %s19_s14, 4   ;;  %s930_s10 = smov %s649_s11 }
 0x151   : > { %s931_s11 = smov %s793_s28  ;;  %s932_s12 = smov %s657_s13 }
 0x152   : > { %s933_s13 = smov %s935_s25  ;;  %18 = sbr.rel (!%p16_p5) target bundleno = 7 (0x7), region = 78 }
 0x159   :  { %332 = vsyncpa [#allocation3], 1 }
 0x15a   :  { %334 = vsyncpa [#allocation3 + $0x1], 1 }
 0x15b   :  { %335 = vsyncpa [#allocation6], 1 }
 0x15c   :  { %337 = vsyncpa [#allocation6 + $0x1], 1 }
 0x15d   :  { %338 = vsyncpa [#allocation4], 1 }
 0x15e   :  { %340 = vsyncpa [#allocation4 + $0x1], 1 }

</bundles_post_ra>
